<compile_context>
chip_gen: v7x
topology: tpu7x:2x2x1
jax: 0.10.0
libtpu: 0.0.40
codegen_flags: <defaults>
</compile_context>

<pallas_src>
import functools

import jax
import jax.numpy as jnp
from jax.experimental import pallas as pl
from jax.experimental.pallas import tpu as pltpu


def _elu(x):
    # ELU(alpha=1): x if x > 0 else exp(x) - 1  (clamp exp arg so the unselected
    # branch of jnp.where cannot overflow).
    return jnp.where(x > 0, x, jnp.exp(jnp.minimum(x, 0.0)) - 1.0)


def deconv_block_kernel(x_ref, m1_ref, b1_ref, m2_ref, b2_ref, out_ref,
                        xh_ref, y1p_ref, *, N, H, W, Cout):
    f32 = jnp.float32
    LN = xh_ref.shape[-1]            # lane-padded conv1-input row width (128)
    CW = y1p_ref.shape[-1]           # conv1-out / conv2 row width = W*Cout (128)
    HP = H + 2                       # per-image H-padded height
    NR = N * HP                      # rows of the flat padded slabs
    M = NR - 2                       # band-matmul M (valid rows + N-1 junk seam pairs)

    # ---- conv1 input slab: per-image interior rows + zero H-halo rows ---------
    zx = jnp.zeros((1, LN), f32)
    for n in range(N):
        base = n * HP
        xh_ref[pl.ds(base, 1), :] = zx
        xh_ref[pl.ds(base + 1, H), :] = x_ref[n]
        xh_ref[pl.ds(base + H + 1, 1), :] = zx

    # ---- conv1 + bias + ELU: three K=128 band matmuls over the contiguous M rows
    # (kx taps and SAME W-zero-padding are folded into the band matrices; the junk
    #  seam rows between images are computed but never used.)
    # NOTE(v5e): the three dots could be fused into one K=3*128 matmul by stacking
    # the bands along K; kept as accumulate-into-first-dot here for robustness.
    acc1 = jnp.dot(xh_ref[pl.ds(0, M), :], m1_ref[0], preferred_element_type=f32)
    acc1 += jnp.dot(xh_ref[pl.ds(1, M), :], m1_ref[1], preferred_element_type=f32)
    acc1 += jnp.dot(xh_ref[pl.ds(2, M), :], m1_ref[2], preferred_element_type=f32)
    y1 = _elu(acc1 + b1_ref[...])                      # (M, CW)

    # ---- conv2 input slab: valid rows land on the interiors, the junk seam rows
    #      land exactly on the halo positions; overwrite all halo rows with zeros
    #      (conv2's SAME padding must see exact zeros, not ELU junk).
    zy = jnp.zeros((1, CW), f32)
    zy2 = jnp.zeros((2, CW), f32)
    y1p_ref[pl.ds(1, M), :] = y1
    y1p_ref[pl.ds(0, 1), :] = zy                       # top halo, image 0
    y1p_ref[pl.ds(NR - 1, 1), :] = zy                  # bottom halo, image N-1
    for n in range(N - 1):                             # adjacent bottom/top halo pairs
        y1p_ref[pl.ds(n * HP + H + 1, 2), :] = zy2

    # ---- conv2 + bias + ELU ----------------------------------------------------
    acc2 = jnp.dot(y1p_ref[pl.ds(0, M), :], m2_ref[0], preferred_element_type=f32)
    acc2 += jnp.dot(y1p_ref[pl.ds(1, M), :], m2_ref[1], preferred_element_type=f32)
    acc2 += jnp.dot(y1p_ref[pl.ds(2, M), :], m2_ref[2], preferred_element_type=f32)
    y2 = _elu(acc2 + b2_ref[...])                      # (M, CW)

    # ---- nearest-x2 along H (sublane repeat) + dense 128-lane stores ----------
    for n in range(N):
        yv = y2[n * HP:n * HP + H]                     # (H, CW) valid rows of image n
        out_ref[n] = jnp.repeat(yv, 2, axis=0).astype(out_ref.dtype)


def _band_matrices(w, W, k_pad=None):
    """w: (Cout, Cin, 3, 3) OIHW -> (3, k_pad or W*Cin, W*Cout) per-ky band matrices.

    Band ky maps one H-row of the input (lane = wi*Cin + ci, wi in [0, W)) to one
    H-row of the conv output (lane = wo*Cout + co).  The kx taps AND the SAME
    W-zero-padding are folded into the selection mask (out-of-range taps simply
    contribute nothing), so no W-halo lanes are needed anywhere."""
    Cout, Cin = w.shape[0], w.shape[1]
    wi = jnp.arange(W)[None, :, None]                  # input col
    wo = jnp.arange(W)[None, None, :]                  # output col
    kx = jnp.arange(3)[:, None, None]
    sel = (wi == wo + kx - 1).astype(w.dtype)          # (3, W, W) cross-correlation taps
    m = jnp.einsum('xab,ocyx->yacbo', sel, w)          # (3, W, Cin, W, Cout)
    m = m.reshape(3, W * Cin, W * Cout)
    if k_pad is not None and k_pad > W * Cin:          # zero K-rows for padded input lanes
        m = jnp.concatenate(
            [m, jnp.zeros((3, k_pad - W * Cin, W * Cout), m.dtype)], axis=1)
    return m


def deconv_block(x_nchw, w1, b1, w2, b2):
    """x_nchw: (N, Cin, H, W); w1: (Cout, Cin, 3, 3); w2: (Cout, Cout, 3, 3)."""
    N, Cin, H, W = x_nchw.shape
    Cout = w1.shape[0]
    f32 = jnp.float32
    CW = W * Cout                                      # conv row width (128 lanes here)
    LN = pl.cdiv(W * Cin, 128) * 128                   # conv1 input row width, lane-padded

    # Layout plumbing (tiny, one-time): NCHW -> (N, H, W*Cin) rows, lane-padded to 128.
    x_rows = jnp.transpose(x_nchw, (0, 2, 3, 1)).reshape(N, H, W * Cin).astype(f32)
    if LN != W * Cin:
        x_rows = jnp.pad(x_rows, ((0, 0), (0, 0), (0, LN - W * Cin)))

    m1 = _band_matrices(w1.astype(f32), W, k_pad=LN)   # (3, 128, 128), zero K-rows 64..127
    m2 = _band_matrices(w2.astype(f32), W)             # (3, 128, 128)
    b1r = jnp.tile(b1.astype(f32), W).reshape(1, CW)   # lane layout wo*Cout + co
    b2r = jnp.tile(b2.astype(f32), W).reshape(1, CW)
    # TODO(synk): for v5e, shipping m1/m2 (and x) as bf16 with f32 accumulation would
    # halve the dominant weight DMA; left in f32 pending tolerance re-validation.

    kernel = functools.partial(deconv_block_kernel, N=N, H=H, W=W, Cout=Cout)

    out_rows = pl.pallas_call(
        kernel,
        out_shape=jax.ShapeDtypeStruct((N, 2 * H, CW), f32),
        grid_spec=pltpu.PrefetchScalarGridSpec(
            num_scalar_prefetch=0,
            grid=(1,),   # batch folded into the matmul M dim (see scale-up note above)
            in_specs=[
                pl.BlockSpec((N, H, LN), lambda i: (0, 0, 0)),
                pl.BlockSpec((3, LN, CW), lambda i: (0, 0, 0)),
                pl.BlockSpec((1, CW), lambda i: (0, 0)),
                pl.BlockSpec((3, CW, CW), lambda i: (0, 0, 0)),
                pl.BlockSpec((1, CW), lambda i: (0, 0)),
            ],
            out_specs=pl.BlockSpec((N, 2 * H, CW), lambda i: (0, 0, 0)),
            scratch_shapes=[
                pltpu.VMEM((N * (H + 2), LN), f32),    # flat H-padded conv1-input slab
                pltpu.VMEM((N * (H + 2), CW), f32),    # flat H-padded conv1-output slab
            ],
        ),
        compiler_params=pltpu.CompilerParams(
            dimension_semantics=("arbitrary",),
        ),
    )(x_rows, m1, b1r, m2, b2r)

    # (N, 2H, W*Cout) -> NCHW.  The nearest-x2 duplication along W is a pure
    # broadcast; it fuses with this (already required) layout transpose.
    out = jnp.transpose(out_rows.reshape(N, 2 * H, W, Cout), (0, 3, 1, 2))
    return jnp.repeat(out, 2, axis=3)


def reference(x_nchw, w1, b1, w2, b2):
    """Pure-JAX reference matching the PyTorch module."""
    x = jnp.transpose(x_nchw, (0, 2, 3, 1))
    w1h = jnp.transpose(w1, (2, 3, 1, 0))
    w2h = jnp.transpose(w2, (2, 3, 1, 0))
    dn = ('NHWC', 'HWIO', 'NHWC')
    y = jax.lax.conv_general_dilated(x, w1h, (1, 1), 'SAME', dimension_numbers=dn) + b1
    y = _elu(y)
    y = jax.lax.conv_general_dilated(y, w2h, (1, 1), 'SAME', dimension_numbers=dn) + b2
    y = _elu(y)
    y = jnp.repeat(jnp.repeat(y, 2, axis=1), 2, axis=2)
    return jnp.transpose(y, (0, 3, 1, 2))


if __name__ == "__main__":
    N, Cin, Cout, H, W = 2, 4, 8, 16, 16

    key = jax.random.PRNGKey(0)
    k_x, k_w1, k_b1, k_w2, k_b2 = jax.random.split(key, 5)

    x = jax.random.normal(k_x, (N, Cin, H, W), dtype=jnp.float32)
    # deterministic synthetic parameters (PyTorch Conv2d weight layout OIHW)
    w1 = 0.1 * jax.random.normal(k_w1, (Cout, Cin, 3, 3), dtype=jnp.float32)
    b1 = 0.1 * jax.random.normal(k_b1, (Cout,), dtype=jnp.float32)
    w2 = 0.1 * jax.random.normal(k_w2, (Cout, Cout, 3, 3), dtype=jnp.float32)
    b2 = 0.1 * jax.random.normal(k_b2, (Cout,), dtype=jnp.float32)

    out = jax.block_until_ready(deconv_block(x, w1, b1, w2, b2))
    ref = jax.block_until_ready(reference(x, w1, b1, w2, b2))

    assert out.shape == (N, Cout, 2 * H, 2 * W), out.shape
    max_err = float(jnp.max(jnp.abs(out - ref)))
    assert jnp.allclose(out, ref, atol=1e-3, rtol=1e-3), max_err

    print("KERNEL_OK")
</pallas_src>

<mosaic_0001>
module attributes {stable_mosaic.version = 11 : i64} {
  func.func @deconv_block_kernel(%arg0: i32, %arg1: memref<2x16x128xf32, #tpu.memory_space<vmem>>, %arg2: memref<3x128x128xf32, #tpu.memory_space<vmem>>, %arg3: memref<1x128xf32, #tpu.memory_space<vmem>>, %arg4: memref<3x128x128xf32, #tpu.memory_space<vmem>>, %arg5: memref<1x128xf32, #tpu.memory_space<vmem>>, %arg6: memref<2x32x128xf32, #tpu.memory_space<vmem>>, %arg7: memref<36x128xf32, #tpu.memory_space<vmem>>, %arg8: memref<36x128xf32, #tpu.memory_space<vmem>>) attributes {dimension_semantics = [#tpu.dimension_semantics<arbitrary>], iteration_bounds = array<i64: 1>, scalar_prefetch = 0 : i64, scratch_operands = 2 : i64, tpu.core_type = #tpu.core_type<tc>, window_params = [{pipeline_mode = #tpu.pipeline_mode<synchronous>, transform_indices = @transform_0, window_bounds = array<i64: 2, 16, 128>}, {pipeline_mode = #tpu.pipeline_mode<synchronous>, transform_indices = @transform_1, window_bounds = array<i64: 3, 128, 128>}, {pipeline_mode = #tpu.pipeline_mode<synchronous>, transform_indices = @transform_2, window_bounds = array<i64: 1, 128>}, {pipeline_mode = #tpu.pipeline_mode<synchronous>, transform_indices = @transform_3, window_bounds = array<i64: 3, 128, 128>}, {pipeline_mode = #tpu.pipeline_mode<synchronous>, transform_indices = @transform_4, window_bounds = array<i64: 1, 128>}, {pipeline_mode = #tpu.pipeline_mode<synchronous>, transform_indices = @transform_5, window_bounds = array<i64: 2, 32, 128>}]} {
    %cst = arith.constant 0.000000e+00 : f32
    %0 = vector.broadcast %cst : f32 to vector<1x128xf32>
    %c0 = arith.constant 0 : index
    %c0_0 = arith.constant 0 : index
    %1 = vector.load %arg7[%c0, %c0_0] : memref<36x128xf32, #tpu.memory_space<vmem>>, vector<1x128xf32>
    tpu.vector_store %arg7[%c0, %c0_0], %0 {strides = array<i32>} : memref<36x128xf32, #tpu.memory_space<vmem>>, vector<1x128xf32>,
    %c0_1 = arith.constant 0 : index
    %c0_2 = arith.constant 0 : index
    %c0_3 = arith.constant 0 : index
    %2 = vector.load %arg1[%c0_1, %c0_2, %c0_3] : memref<2x16x128xf32, #tpu.memory_space<vmem>>, vector<1x16x128xf32>
    %3 = vector.shape_cast %2 : vector<1x16x128xf32> to vector<16x128xf32>
    %c1 = arith.constant 1 : index
    %c0_4 = arith.constant 0 : index
    %4 = vector.load %arg7[%c1, %c0_4] : memref<36x128xf32, #tpu.memory_space<vmem>>, vector<16x128xf32>
    tpu.vector_store %arg7[%c1, %c0_4], %3 {strides = array<i32>} : memref<36x128xf32, #tpu.memory_space<vmem>>, vector<16x128xf32>,
    %c17 = arith.constant 17 : index
    %c0_5 = arith.constant 0 : index
    %5 = vector.load %arg7[%c17, %c0_5] : memref<36x128xf32, #tpu.memory_space<vmem>>, vector<1x128xf32>
    tpu.vector_store %arg7[%c17, %c0_5], %0 {strides = array<i32>} : memref<36x128xf32, #tpu.memory_space<vmem>>, vector<1x128xf32>,
    %c18 = arith.constant 18 : index
    %c0_6 = arith.constant 0 : index
    %6 = vector.load %arg7[%c18, %c0_6] : memref<36x128xf32, #tpu.memory_space<vmem>>, vector<1x128xf32>
    tpu.vector_store %arg7[%c18, %c0_6], %0 {strides = array<i32>} : memref<36x128xf32, #tpu.memory_space<vmem>>, vector<1x128xf32>,
    %c1_7 = arith.constant 1 : index
    %c0_8 = arith.constant 0 : index
    %c0_9 = arith.constant 0 : index
    %7 = vector.load %arg1[%c1_7, %c0_8, %c0_9] : memref<2x16x128xf32, #tpu.memory_space<vmem>>, vector<1x16x128xf32>
    %8 = vector.shape_cast %7 : vector<1x16x128xf32> to vector<16x128xf32>
    %c19 = arith.constant 19 : index
    %c0_10 = arith.constant 0 : index
    %9 = vector.load %arg7[%c19, %c0_10] : memref<36x128xf32, #tpu.memory_space<vmem>>, vector<16x128xf32>
    tpu.vector_store %arg7[%c19, %c0_10], %8 {strides = array<i32>} : memref<36x128xf32, #tpu.memory_space<vmem>>, vector<16x128xf32>,
    %c35 = arith.constant 35 : index
    %c0_11 = arith.constant 0 : index
    %10 = vector.load %arg7[%c35, %c0_11] : memref<36x128xf32, #tpu.memory_space<vmem>>, vector<1x128xf32>
    tpu.vector_store %arg7[%c35, %c0_11], %0 {strides = array<i32>} : memref<36x128xf32, #tpu.memory_space<vmem>>, vector<1x128xf32>,
    %c0_12 = arith.constant 0 : index
    %c0_13 = arith.constant 0 : index
    %11 = vector.load %arg7[%c0_12, %c0_13] : memref<36x128xf32, #tpu.memory_space<vmem>>, vector<34x128xf32>
    %c0_14 = arith.constant 0 : index
    %c0_15 = arith.constant 0 : index
    %c0_16 = arith.constant 0 : index
    %12 = vector.load %arg2[%c0_14, %c0_15, %c0_16] : memref<3x128x128xf32, #tpu.memory_space<vmem>>, vector<1x128x128xf32>
    %13 = vector.shape_cast %12 : vector<1x128x128xf32> to vector<128x128xf32>
    %cst_17 = arith.constant dense<0.000000e+00> : vector<34x128xf32>
    %14 = tpu.matmul %11, %13, %cst_17 {dimension_numbers = #tpu.dot_dimension_numbers<[1], [0], [0], [1], [0, 0, 1, 1], [], []>} : vector<34x128xf32>, vector<128x128xf32>, vector<34x128xf32> -> vector<34x128xf32>
    %c1_18 = arith.constant 1 : index
    %c0_19 = arith.constant 0 : index
    %15 = vector.load %arg7[%c1_18, %c0_19] : memref<36x128xf32, #tpu.memory_space<vmem>>, vector<34x128xf32>
    %c1_20 = arith.constant 1 : index
    %c0_21 = arith.constant 0 : index
    %c0_22 = arith.constant 0 : index
    %16 = vector.load %arg2[%c1_20, %c0_21, %c0_22] : memref<3x128x128xf32, #tpu.memory_space<vmem>>, vector<1x128x128xf32>
    %17 = vector.shape_cast %16 : vector<1x128x128xf32> to vector<128x128xf32>
    %cst_23 = arith.constant dense<0.000000e+00> : vector<34x128xf32>
    %18 = tpu.matmul %15, %17, %cst_23 {dimension_numbers = #tpu.dot_dimension_numbers<[1], [0], [0], [1], [0, 0, 1, 1], [], []>} : vector<34x128xf32>, vector<128x128xf32>, vector<34x128xf32> -> vector<34x128xf32>
    %19 = arith.addf %14, %18 : vector<34x128xf32>
    %c2 = arith.constant 2 : index
    %c0_24 = arith.constant 0 : index
    %20 = vector.load %arg7[%c2, %c0_24] : memref<36x128xf32, #tpu.memory_space<vmem>>, vector<34x128xf32>
    %c2_25 = arith.constant 2 : index
    %c0_26 = arith.constant 0 : index
    %c0_27 = arith.constant 0 : index
    %21 = vector.load %arg2[%c2_25, %c0_26, %c0_27] : memref<3x128x128xf32, #tpu.memory_space<vmem>>, vector<1x128x128xf32>
    %22 = vector.shape_cast %21 : vector<1x128x128xf32> to vector<128x128xf32>
    %cst_28 = arith.constant dense<0.000000e+00> : vector<34x128xf32>
    %23 = tpu.matmul %20, %22, %cst_28 {dimension_numbers = #tpu.dot_dimension_numbers<[1], [0], [0], [1], [0, 0, 1, 1], [], []>} : vector<34x128xf32>, vector<128x128xf32>, vector<34x128xf32> -> vector<34x128xf32>
    %24 = arith.addf %19, %23 : vector<34x128xf32>
    %c0_29 = arith.constant 0 : index
    %c0_30 = arith.constant 0 : index
    %25 = vector.load %arg3[%c0_29, %c0_30] : memref<1x128xf32, #tpu.memory_space<vmem>>, vector<1x128xf32>
    %26 = vector.broadcast %25 : vector<1x128xf32> to vector<34x128xf32>
    %27 = arith.addf %24, %26 : vector<34x128xf32>
    %cst_31 = arith.constant 0.000000e+00 : f32
    %28 = vector.broadcast %cst_31 : f32 to vector<34x128xf32>
    %29 = arith.cmpf ogt, %27, %28 : vector<34x128xf32>
    %cst_32 = arith.constant 0.000000e+00 : f32
    %30 = vector.broadcast %cst_32 : f32 to vector<34x128xf32>
    %31 = arith.minimumf %27, %30 : vector<34x128xf32>
    %32 = math.exp %31 : vector<34x128xf32>
    %cst_33 = arith.constant 1.000000e+00 : f32
    %33 = vector.broadcast %cst_33 : f32 to vector<34x128xf32>
    %34 = arith.subf %32, %33 : vector<34x128xf32>
    %35 = arith.select %29, %27, %34 : vector<34x128xi1>, vector<34x128xf32>
    %cst_34 = arith.constant 0.000000e+00 : f32
    %36 = vector.broadcast %cst_34 : f32 to vector<1x128xf32>
    %cst_35 = arith.constant 0.000000e+00 : f32
    %37 = vector.broadcast %cst_35 : f32 to vector<2x128xf32>
    %c1_36 = arith.constant 1 : index
    %c0_37 = arith.constant 0 : index
    %38 = vector.load %arg8[%c1_36, %c0_37] : memref<36x128xf32, #tpu.memory_space<vmem>>, vector<34x128xf32>
    tpu.vector_store %arg8[%c1_36, %c0_37], %35 {strides = array<i32>} : memref<36x128xf32, #tpu.memory_space<vmem>>, vector<34x128xf32>,
    %c0_38 = arith.constant 0 : index
    %c0_39 = arith.constant 0 : index
    %39 = vector.load %arg8[%c0_38, %c0_39] : memref<36x128xf32, #tpu.memory_space<vmem>>, vector<1x128xf32>
    tpu.vector_store %arg8[%c0_38, %c0_39], %36 {strides = array<i32>} : memref<36x128xf32, #tpu.memory_space<vmem>>, vector<1x128xf32>,
    %c35_40 = arith.constant 35 : index
    %c0_41 = arith.constant 0 : index
    %40 = vector.load %arg8[%c35_40, %c0_41] : memref<36x128xf32, #tpu.memory_space<vmem>>, vector<1x128xf32>
    tpu.vector_store %arg8[%c35_40, %c0_41], %36 {strides = array<i32>} : memref<36x128xf32, #tpu.memory_space<vmem>>, vector<1x128xf32>,
    %c17_42 = arith.constant 17 : index
    %c0_43 = arith.constant 0 : index
    %41 = vector.load %arg8[%c17_42, %c0_43] : memref<36x128xf32, #tpu.memory_space<vmem>>, vector<2x128xf32>
    tpu.vector_store %arg8[%c17_42, %c0_43], %37 {strides = array<i32>} : memref<36x128xf32, #tpu.memory_space<vmem>>, vector<2x128xf32>,
    %c0_44 = arith.constant 0 : index
    %c0_45 = arith.constant 0 : index
    %42 = vector.load %arg8[%c0_44, %c0_45] : memref<36x128xf32, #tpu.memory_space<vmem>>, vector<34x128xf32>
    %c0_46 = arith.constant 0 : index
    %c0_47 = arith.constant 0 : index
    %c0_48 = arith.constant 0 : index
    %43 = vector.load %arg4[%c0_46, %c0_47, %c0_48] : memref<3x128x128xf32, #tpu.memory_space<vmem>>, vector<1x128x128xf32>
    %44 = vector.shape_cast %43 : vector<1x128x128xf32> to vector<128x128xf32>
    %cst_49 = arith.constant dense<0.000000e+00> : vector<34x128xf32>
    %45 = tpu.matmul %42, %44, %cst_49 {dimension_numbers = #tpu.dot_dimension_numbers<[1], [0], [0], [1], [0, 0, 1, 1], [], []>} : vector<34x128xf32>, vector<128x128xf32>, vector<34x128xf32> -> vector<34x128xf32>
    %c1_50 = arith.constant 1 : index
    %c0_51 = arith.constant 0 : index
    %46 = vector.load %arg8[%c1_50, %c0_51] : memref<36x128xf32, #tpu.memory_space<vmem>>, vector<34x128xf32>
    %c1_52 = arith.constant 1 : index
    %c0_53 = arith.constant 0 : index
    %c0_54 = arith.constant 0 : index
    %47 = vector.load %arg4[%c1_52, %c0_53, %c0_54] : memref<3x128x128xf32, #tpu.memory_space<vmem>>, vector<1x128x128xf32>
    %48 = vector.shape_cast %47 : vector<1x128x128xf32> to vector<128x128xf32>
    %cst_55 = arith.constant dense<0.000000e+00> : vector<34x128xf32>
    %49 = tpu.matmul %46, %48, %cst_55 {dimension_numbers = #tpu.dot_dimension_numbers<[1], [0], [0], [1], [0, 0, 1, 1], [], []>} : vector<34x128xf32>, vector<128x128xf32>, vector<34x128xf32> -> vector<34x128xf32>
    %50 = arith.addf %45, %49 : vector<34x128xf32>
    %c2_56 = arith.constant 2 : index
    %c0_57 = arith.constant 0 : index
    %51 = vector.load %arg8[%c2_56, %c0_57] : memref<36x128xf32, #tpu.memory_space<vmem>>, vector<34x128xf32>
    %c2_58 = arith.constant 2 : index
    %c0_59 = arith.constant 0 : index
    %c0_60 = arith.constant 0 : index
    %52 = vector.load %arg4[%c2_58, %c0_59, %c0_60] : memref<3x128x128xf32, #tpu.memory_space<vmem>>, vector<1x128x128xf32>
    %53 = vector.shape_cast %52 : vector<1x128x128xf32> to vector<128x128xf32>
    %cst_61 = arith.constant dense<0.000000e+00> : vector<34x128xf32>
    %54 = tpu.matmul %51, %53, %cst_61 {dimension_numbers = #tpu.dot_dimension_numbers<[1], [0], [0], [1], [0, 0, 1, 1], [], []>} : vector<34x128xf32>, vector<128x128xf32>, vector<34x128xf32> -> vector<34x128xf32>
    %55 = arith.addf %50, %54 : vector<34x128xf32>
    %c0_62 = arith.constant 0 : index
    %c0_63 = arith.constant 0 : index
    %56 = vector.load %arg5[%c0_62, %c0_63] : memref<1x128xf32, #tpu.memory_space<vmem>>, vector<1x128xf32>
    %57 = vector.broadcast %56 : vector<1x128xf32> to vector<34x128xf32>
    %58 = arith.addf %55, %57 : vector<34x128xf32>
    %cst_64 = arith.constant 0.000000e+00 : f32
    %59 = vector.broadcast %cst_64 : f32 to vector<34x128xf32>
    %60 = arith.cmpf ogt, %58, %59 : vector<34x128xf32>
    %cst_65 = arith.constant 0.000000e+00 : f32
    %61 = vector.broadcast %cst_65 : f32 to vector<34x128xf32>
    %62 = arith.minimumf %58, %61 : vector<34x128xf32>
    %63 = math.exp %62 : vector<34x128xf32>
    %cst_66 = arith.constant 1.000000e+00 : f32
    %64 = vector.broadcast %cst_66 : f32 to vector<34x128xf32>
    %65 = arith.subf %63, %64 : vector<34x128xf32>
    %66 = arith.select %60, %58, %65 : vector<34x128xi1>, vector<34x128xf32>
    %67 = vector.extract_strided_slice %66 {offsets = [0, 0], sizes = [16, 128], strides = [1, 1]} : vector<34x128xf32> to vector<16x128xf32>
    %68 = vector.shape_cast %67 : vector<16x128xf32> to vector<16x1x128xf32>
    %69 = vector.broadcast %68 : vector<16x1x128xf32> to vector<16x2x128xf32>
    %70 = vector.shape_cast %69 : vector<16x2x128xf32> to vector<32x128xf32>
    %c0_67 = arith.constant 0 : index
    %c0_68 = arith.constant 0 : index
    %c0_69 = arith.constant 0 : index
    %71 = vector.load %arg6[%c0_67, %c0_68, %c0_69] : memref<2x32x128xf32, #tpu.memory_space<vmem>>, vector<1x32x128xf32>
    %72 = vector.shape_cast %71 : vector<1x32x128xf32> to vector<32x128xf32>
    %73 = vector.shape_cast %70 : vector<32x128xf32> to vector<1x32x128xf32>
    tpu.vector_store %arg6[%c0_67, %c0_68, %c0_69], %73 {strides = array<i32>} : memref<2x32x128xf32, #tpu.memory_space<vmem>>, vector<1x32x128xf32>,
    %74 = vector.extract_strided_slice %66 {offsets = [18, 0], sizes = [16, 128], strides = [1, 1]} : vector<34x128xf32> to vector<16x128xf32>
    %75 = vector.shape_cast %74 : vector<16x128xf32> to vector<16x1x128xf32>
    %76 = vector.broadcast %75 : vector<16x1x128xf32> to vector<16x2x128xf32>
    %77 = vector.shape_cast %76 : vector<16x2x128xf32> to vector<32x128xf32>
    %c1_70 = arith.constant 1 : index
    %c0_71 = arith.constant 0 : index
    %c0_72 = arith.constant 0 : index
    %78 = vector.load %arg6[%c1_70, %c0_71, %c0_72] : memref<2x32x128xf32, #tpu.memory_space<vmem>>, vector<1x32x128xf32>
    %79 = vector.shape_cast %78 : vector<1x32x128xf32> to vector<32x128xf32>
    %80 = vector.shape_cast %77 : vector<32x128xf32> to vector<1x32x128xf32>
    tpu.vector_store %arg6[%c1_70, %c0_71, %c0_72], %80 {strides = array<i32>} : memref<2x32x128xf32, #tpu.memory_space<vmem>>, vector<1x32x128xf32>,
    return
  }
  func.func @transform_0(%arg0: i32) -> (i32, i32, i32) {
    %c0_i32 = arith.constant 0 : i32
    %c0_i32_0 = arith.constant 0 : i32
    %c0_i32_1 = arith.constant 0 : i32
    %c0_i32_2 = arith.constant 0 : i32
    return %c0_i32, %c0_i32_0, %c0_i32_1 : i32, i32, i32
  }
  func.func @transform_1(%arg0: i32) -> (i32, i32, i32) {
    %c0_i32 = arith.constant 0 : i32
    %c0_i32_0 = arith.constant 0 : i32
    %c0_i32_1 = arith.constant 0 : i32
    %c0_i32_2 = arith.constant 0 : i32
    return %c0_i32, %c0_i32_0, %c0_i32_1 : i32, i32, i32
  }
  func.func @transform_2(%arg0: i32) -> (i32, i32) {
    %c0_i32 = arith.constant 0 : i32
    %c0_i32_0 = arith.constant 0 : i32
    %c0_i32_1 = arith.constant 0 : i32
    return %c0_i32, %c0_i32_0 : i32, i32
  }
  func.func @transform_3(%arg0: i32) -> (i32, i32, i32) {
    %c0_i32 = arith.constant 0 : i32
    %c0_i32_0 = arith.constant 0 : i32
    %c0_i32_1 = arith.constant 0 : i32
    %c0_i32_2 = arith.constant 0 : i32
    return %c0_i32, %c0_i32_0, %c0_i32_1 : i32, i32, i32
  }
  func.func @transform_4(%arg0: i32) -> (i32, i32) {
    %c0_i32 = arith.constant 0 : i32
    %c0_i32_0 = arith.constant 0 : i32
    %c0_i32_1 = arith.constant 0 : i32
    return %c0_i32, %c0_i32_0 : i32, i32
  }
  func.func @transform_5(%arg0: i32) -> (i32, i32, i32) {
    %c0_i32 = arith.constant 0 : i32
    %c0_i32_0 = arith.constant 0 : i32
    %c0_i32_1 = arith.constant 0 : i32
    %c0_i32_2 = arith.constant 0 : i32
    return %c0_i32, %c0_i32_0, %c0_i32_1 : i32, i32, i32
  }
}

</mosaic_0001>

<bundles_post_ra>
// kernel: tpu_custom_call.1
= control target key start
LH: loop header
LB: loop body
LE: loop exit
PB: predicated region body
PF: predicated region fallthrough
CT: control target
= control target key end

     0   :  { %10 = vsyncpa [#allocation5], 0  ;;  %s2389_s0 = inlined_call_operand.hbm [shape: f32[2,16,128], index: 0, kind: input, shape index: {}]   ;;  %s2390_s1 = inlined_call_operand.hbm [shape: f32[3,128,128], index: 1, kind: input, shape index: {}]   ;;  %s2391_s2 = inlined_call_operand.vmem [shape: f32[1,128], index: 2, kind: input, shape index: {}]   ;;  %s2392_s3 = inlined_call_operand.hbm [shape: f32[3,128,128], index: 3, kind: input, shape index: {}]   ;;  %s2393_s4 = inlined_call_operand.vmem [shape: f32[1,128], index: 4, kind: input, shape index: {}]   ;;  %s2394_s5 = inlined_call_operand.hbm [shape: f32[2,32,128], index: 5, kind: output, shape index: {}]  }
   0x1   :  { %11 = vsyncpa [#allocation8], 0 }
   0x2   :  { %12 = vsyncpa [#allocation6], 0  ;;  %s2058_s18 = smov [#allocation7]   ;;  %s2059_s20 = smov [#allocation4]  }
   0x3   :  { %s30_s19 = sshll.u32 %s2058_s18, 4  ;;  %s18_s21 = sshll.u32 %s2059_s20, 4  ;;  %s31_s19 = int_to_ptr.vmem [resolvable:$true] %s30_s19  ;;  %s2099_s21 = int_to_ptr.vmem [resolvable:$true] %s18_s21 }
   0x4   :  { %s1964_s24 = scalar_lea.hbm %s2390_s1, 6144 }
   0x5   :  { %p1965_p0 = scmp.ne.s32.totalorder %s2390_s1, %s1964_s24  ;;  %p1968_p1 = scmp.lt.u32.totalorder %s1964_s24, %s2390_s1 }
   0x7   :  { %p1970_p2 = pnand %p1968_p1, %p1965_p0 }
   0x9   :  { %1973 = shalt.err (!%p1970_p2)
}
   0xa   :  { %s1974_s29 = scalar_lea.vmem %s31_s19, 6144  ;;  %p1979_p4 = scmp.lt.s32.totalorder %s31_s19, %s31_s19 }
   0xb   :  { %p1975_p3 = scmp.ne.s32.totalorder %s31_s19, %s1974_s29  ;;  %p1980_p5 = scmp.lt.s32.totalorder %s1974_s29, %s1974_s29 }
   0xd   :  { %p1981_p6 = por %p1980_p5, %p1979_p4 }
   0xf   :  { %p1982_p7 = pnand %p1981_p6, %p1975_p3 }
  0x11   :  { %1985 = shalt.err (!%p1982_p7)
}
  0x12   :  { %s2060_s30 = smov 128   ;;  %s2061_s6 = smov 8  }
  0x13   :  { %36 = dma.hbm_to_vmem [thread:$0]  %s2390_s1, 6144, %s31_s19, [#allocation8], %s2060_s30, %s2060_s30, %s2061_s6  }
  0x14   :  { %s1986_s11 = scalar_lea.hbm %s2389_s0, 512 }
  0x15   :  { %p1987_p8 = scmp.ne.s32.totalorder %s2389_s0, %s1986_s11  ;;  %p1990_p9 = scmp.lt.u32.totalorder %s1986_s11, %s2389_s0 }
  0x17   :  { %p1992_p10 = pnand %p1990_p9, %p1987_p8 }
  0x19   :  { %1995 = shalt.err (!%p1992_p10)
}
  0x1a   :  { %s1996_s16 = scalar_lea.vmem %s2099_s21, 512  ;;  %p2001_p12 = scmp.lt.s32.totalorder %s2099_s21, %s2099_s21 }
  0x1b   :  { %p1997_p11 = scmp.ne.s32.totalorder %s2099_s21, %s1996_s16  ;;  %p2002_p13 = scmp.lt.s32.totalorder %s1996_s16, %s1996_s16 }
  0x1d   :  { %p2003_p0 = por %p2002_p13, %p2001_p12 }
  0x1f   :  { %p2004_p1 = pnand %p2003_p0, %p1997_p11 }
  0x21   :  { %2007 = shalt.err (!%p2004_p1)
}
  0x22   :  { %24 = dma.hbm_to_vmem [thread:$0]  %s2389_s0, 512, %s2099_s21, [#allocation5], %s2060_s30, %s2060_s30, %s2061_s6  }
  0x23   :  { %s2062_s18 = smov [#allocation9]   ;;  %s2008_s23 = scalar_lea.hbm %s2392_s3, 6144 }
  0x24   :  { %s44_s19 = sshll.u32 %s2062_s18, 4  ;;  %p2009_p2 = scmp.ne.s32.totalorder %s2392_s3, %s2008_s23  ;;  %s45_s19 = int_to_ptr.vmem [resolvable:$true] %s44_s19 }
  0x25   :  { %p2012_p3 = scmp.lt.u32.totalorder %s2008_s23, %s2392_s3 }
  0x27   :  { %p2014_p4 = pnand %p2012_p3, %p2009_p2 }
  0x29   :  { %2017 = shalt.err (!%p2014_p4)
}
  0x2a   :  { %s2018_s28 = scalar_lea.vmem %s45_s19, 6144  ;;  %p2023_p6 = scmp.lt.s32.totalorder %s45_s19, %s45_s19 }
  0x2b   :  { %p2019_p5 = scmp.ne.s32.totalorder %s45_s19, %s2018_s28  ;;  %p2024_p7 = scmp.lt.s32.totalorder %s2018_s28, %s2018_s28 }
  0x2d   :  { %p2025_p8 = por %p2024_p7, %p2023_p6 }
  0x2f   :  { %p2026_p9 = pnand %p2025_p8, %p2019_p5 }
  0x31   :  { %2029 = shalt.err (!%p2026_p9)
}
  0x32   :  { %50 = dma.hbm_to_vmem [thread:$0]  %s2392_s3, 6144, %s45_s19, [#allocation8], %s2060_s30, %s2060_s30, %s2061_s6  }
  0x33   :  { %2052 = dma.done.wait [#allocation5], 512  }
  0x34   :  { %2053 = vsyncadd [#allocation5], 4294966784 }
  0x35   :  { %2054 = dma.done.wait [#allocation8], 12288  }
  0x36   :  { %2055 = vsyncadd [#allocation8], 4294955008  ;;  %v2063_v0 = vmov 0.0|0.0   ;;  %v2064_v1 = vmov 0.0   ;;  %vm2065_vm0 = vmmov 0   ;;  %v102_v2 = vld [vmem:[#allocation7 + $0x80] sm:$0xff] }
  0x37   :  { %1789 = vmatprep.subr.bf16.mxu0 %v2063_v0  ;;  %1813 = vmatprep.subr.bf16.mxu1 %v2063_v0  ;;  %62 = vst [vmem:[#allocation2] sm:$0x1] %v2064_v1  ;;  %67 = vst [vmem:[#allocation2 + $0x11] sm:$0x1] %v2064_v1  ;;  %v103_v3 = vld [vmem:[#allocation7 + $0x88] sm:$0xff]  ;;  %v80_v4 = vld [vmem:[#allocation7] sm:$0xff] }
  0x38   :  { %68 = vst [vmem:[#allocation2 + $0x12] sm:$0x1] %v2064_v1  ;;  %74 = vst [vmem:[#allocation2 + $0x23] sm:$0x1] %v2064_v1  ;;  %1539 = vmatprep.mubr.msk.f32.mxu0 %vm2065_vm0, %v2064_v1  ;;  %1586 = vmatprep.mubr.msk.f32.mxu1 %vm2065_vm0, %v2064_v1  ;;  %v1790_v5 = vpack.c.bf16 %v103_v3, %v102_v2  ;;  %v81_v6 = vld [vmem:[#allocation7 + $0x8] sm:$0xff]  ;;  %v104_v7 = vld [vmem:[#allocation7 + $0x90] sm:$0xff] }
  0x39   :  { %462 = vst [vmem:[#allocation3] sm:$0x1] %v2064_v1  ;;  %463 = vst [vmem:[#allocation3 + $0x23] sm:$0x1] %v2064_v1  ;;  %v105_v8 = vld [vmem:[#allocation7 + $0x98] sm:$0xff]  ;;  %v1814_v9 = vpack.c.bf16 %v81_v6, %v80_v4  ;;  %v82_v10 = vld [vmem:[#allocation7 + $0x10] sm:$0xff] }
  0x3a   :  { %v83_v11 = vld [vmem:[#allocation7 + $0x18] sm:$0xff]  ;;  %1791 = vmatpush3.bf16.msra.mxu0 %v1790_v5  ;;  %v1793_v12 = vpack.c.bf16 %v105_v8, %v104_v7  ;;  %v106_v14 = vld [vmem:[#allocation7 + $0xa0] sm:$0xff]  ;;  %v107_v15 = vld [vmem:[#allocation7 + $0xa8] sm:$0xff] }
  0x3b   :  { %1815 = vmatpush3.bf16.msra.mxu1 %v1814_v9  ;;  %1792 = vmatprep.subr.bf16.mxu0 %v2063_v0  ;;  %v1817_v13 = vpack.c.bf16 %v83_v11, %v82_v10  ;;  %v84_v16 = vld [vmem:[#allocation7 + $0x20] sm:$0xff]  ;;  %v85_v17 = vld [vmem:[#allocation7 + $0x28] sm:$0xff]  ;;  %v1796_v18 = vpack.c.bf16 %v107_v15, %v106_v14  ;;  %v108_v20 = vld [vmem:[#allocation7 + $0xb0] sm:$0xff] }
  0x3c   :  { %1816 = vmatprep.subr.bf16.mxu1 %v2063_v0  ;;  %v1820_v19 = vpack.c.bf16 %v85_v17, %v84_v16  ;;  %v109_v21 = vld [vmem:[#allocation7 + $0xb8] sm:$0xff]  ;;  %v86_v22 = vld [vmem:[#allocation7 + $0x30] sm:$0xff]  ;;  %v2167_v24 = vld [vmem:[#allocation4] sm:$0xff] }
  0x3d   :  { %v87_v23 = vld [vmem:[#allocation7 + $0x38] sm:$0xff]  ;;  %v1799_v25 = vpack.c.bf16 %v109_v21, %v108_v20  ;;  %65 = vst [vmem:[#allocation2 + $0x1] sm:$0xff] %v2167_v24  ;;  %v110_v27 = vld [vmem:[#allocation7 + $0xc0] sm:$0xff]  ;;  %v111_v28 = vld [vmem:[#allocation7 + $0xc8] sm:$0xff] }
  0x3e   :  { %1794 = vmatpush3.bf16.msra.mxu0 %v1793_v12  ;;  %v1823_v26 = vpack.c.bf16 %v87_v23, %v86_v22  ;;  %v88_v29 = vld [vmem:[#allocation7 + $0x40] sm:$0xff]  ;;  %v89_v30 = vld [vmem:[#allocation7 + $0x48] sm:$0xff]  ;;  %v70_v32 = vld [vmem:[#allocation4 + $0x10] sm:$0xff]  ;;  %v1802_v33 = vpack.c.bf16 %v111_v28, %v110_v27 }
  0x3f   :  { %1818 = vmatpush3.bf16.msra.mxu1 %v1817_v13  ;;  %1795 = vmatprep.subr.bf16.mxu0 %v2063_v0  ;;  %v64_v31 = vld [vmem:[#allocation4 + $0x8] sm:$0xff]  ;;  %72 = vst [vmem:[#allocation2 + $0x13] sm:$0xff] %v70_v32  ;;  %v71_v34 = vld [vmem:[#allocation4 + $0x18] sm:$0xff]  ;;  %v1826_v35 = vpack.c.bf16 %v89_v30, %v88_v29  ;;  %v112_v36 = vld [vmem:[#allocation7 + $0xd0] sm:$0xff] }
  0x40   :  { %1819 = vmatprep.subr.bf16.mxu1 %v2063_v0  ;;  %66 = vst [vmem:[#allocation2 + $0x9] sm:$0xff] %v64_v31  ;;  %v113_v37 = vld [vmem:[#allocation7 + $0xd8] sm:$0xff]  ;;  %73 = vst [vmem:[#allocation2 + $0x1b] sm:$0xff] %v71_v34  ;;  %v90_v38 = vld [vmem:[#allocation7 + $0x50] sm:$0xff] }
  0x41   :  { %v91_v39 = vld [vmem:[#allocation7 + $0x58] sm:$0xff]  ;;  %v1805_v40 = vpack.c.bf16 %v113_v37, %v112_v36  ;;  %v114_v42 = vld [vmem:[#allocation7 + $0xe0] sm:$0xff]  ;;  %v115_v43 = vld [vmem:[#allocation7 + $0xe8] sm:$0xff] }
  0x42   :  { %1797 = vmatpush3.bf16.msra.mxu0 %v1796_v18  ;;  %v1829_v41 = vpack.c.bf16 %v91_v39, %v90_v38  ;;  %v92_v44 = vld [vmem:[#allocation7 + $0x60] sm:$0xff]  ;;  %v93_v45 = vld [vmem:[#allocation7 + $0x68] sm:$0xff]  ;;  %v1808_v46 = vpack.c.bf16 %v115_v43, %v114_v42  ;;  %v116_v48 = vld [vmem:[#allocation7 + $0xf0] sm:$0xff] }
  0x43   :  { %1821 = vmatpush3.bf16.msra.mxu1 %v1820_v19  ;;  %1798 = vmatprep.subr.bf16.mxu0 %v2063_v0  ;;  %v1832_v47 = vpack.c.bf16 %v93_v45, %v92_v44  ;;  %v117_v49 = vld [vmem:[#allocation7 + $0xf8] sm:$0xff]  ;;  %v94_v50 = vld [vmem:[#allocation7 + $0x70] sm:$0xff]  ;;  %v304_v54 = vld [vmem:[#allocation7 + $0x100] sm:$0xff] }
  0x44   :  { %1822 = vmatprep.subr.bf16.mxu1 %v2063_v0  ;;  %v95_v51 = vld [vmem:[#allocation7 + $0x78] sm:$0xff]  ;;  %v1811_v52 = vpack.c.bf16 %v117_v49, %v116_v48  ;;  %v305_v55 = vld [vmem:[#allocation7 + $0x108] sm:$0xff]  ;;  %v75_v57 = vld [vmem:[#allocation2] sm:$0xff] }
  0x45   :  { %v1835_v53 = vpack.c.bf16 %v95_v51, %v94_v50  ;;  %v1838_v56 = vpack.c.bf16 %v305_v55, %v304_v54  ;;  %v306_v58 = vld [vmem:[#allocation7 + $0x110] sm:$0xff]  ;;  %v307_v59 = vld [vmem:[#allocation7 + $0x118] sm:$0xff]  ;;  %v308_v61 = vld [vmem:[#allocation7 + $0x120] sm:$0xff] }
  0x46   :  { %1800 = vmatpush3.bf16.msra.mxu0 %v1799_v25  ;;  %v1841_v60 = vpack.c.bf16 %v307_v59, %v306_v58  ;;  %v309_v62 = vld [vmem:[#allocation7 + $0x128] sm:$0xff]  ;;  %v310_v4 = vld [vmem:[#allocation7 + $0x130] sm:$0xff]  ;;  %v311_v5 = vld [vmem:[#allocation7 + $0x138] sm:$0xff] }
  0x47   :  { %1824 = vmatpush3.bf16.msra.mxu1 %v1823_v26  ;;  %1801 = vmatprep.subr.bf16.mxu0 %v2063_v0  ;;  %v76_v63 = vld [vmem:[#allocation2 + $0x8] sm:$0xff]  ;;  %v1844_v2 = vpack.c.bf16 %v309_v62, %v308_v61  ;;  %v98_v3 = vld [vmem:[#allocation2 + $0x11] sm:$0xff]  ;;  %v1847_v7 = vpack.c.bf16 %v311_v5, %v310_v4  ;;  %v99_v8 = vld [vmem:[#allocation2 + $0x19] sm:$0xff] }
  0x48   :  { %1825 = vmatprep.subr.bf16.mxu1 %v2063_v0  ;;  %v77_v6 = vld [vmem:[#allocation2 + $0x10] sm:$0xff]  ;;  %v313_v10 = vld [vmem:[#allocation7 + $0x148] sm:$0xff]  ;;  %v100_v13 = vld [vmem:[#allocation2 + $0x21] sm:$0x3] }
  0x49   :  { %v312_v9 = vld [vmem:[#allocation7 + $0x140] sm:$0xff]  ;;  %v78_v11 = vld [vmem:[#allocation2 + $0x18] sm:$0xff]  ;;  %v314_v14 = vld [vmem:[#allocation7 + $0x150] sm:$0xff] }
  0x4a   :  { %1803 = vmatpush3.bf16.msra.mxu0 %v1802_v33  ;;  %v1850_v12 = vpack.c.bf16 %v313_v10, %v312_v9  ;;  %v315_v15 = vld [vmem:[#allocation7 + $0x158] sm:$0xff]  ;;  %v79_v16 = vld [vmem:[#allocation2 + $0x20] sm:$0x3]  ;;  %v316_v18 = vld [vmem:[#allocation7 + $0x160] sm:$0xff] }
  0x4b   :  { %1827 = vmatpush3.bf16.msra.mxu1 %v1826_v35  ;;  %1804 = vmatprep.subr.bf16.mxu0 %v2063_v0  ;;  %v1853_v17 = vpack.c.bf16 %v315_v15, %v314_v14  ;;  %v317_v19 = vld [vmem:[#allocation7 + $0x168] sm:$0xff]  ;;  %v318_v21 = vld [vmem:[#allocation7 + $0x170] sm:$0xff]  ;;  %v319_v22 = vld [vmem:[#allocation7 + $0x178] sm:$0xff] }
  0x4c   :  { %1828 = vmatprep.subr.bf16.mxu1 %v2063_v0  ;;  %v1856_v20 = vpack.c.bf16 %v317_v19, %v316_v18  ;;  %v1859_v23 = vpack.c.bf16 %v319_v22, %v318_v21  ;;  %v299_v25 = vld [vmem:[#allocation2 + $0xa] sm:$0xff]  ;;  %v300_v26 = vld [vmem:[#allocation2 + $0x12] sm:$0xff]  ;;  %v301_v27 = vld [vmem:[#allocation2 + $0x1a] sm:$0xff] }
  0x4d   :  { %v302_v28 = vld [vmem:[#allocation2 + $0x22] sm:$0x3]  ;;  %v492_v29 = vld [vmem:[#allocation9 + $0x80] sm:$0xff]  ;;  %v493_v30 = vld [vmem:[#allocation9 + $0x88] sm:$0xff] }
  0x4e   :  { %1806 = vmatpush3.bf16.msra.mxu0 %v1805_v40  ;;  %v494_v32 = vld [vmem:[#allocation9 + $0x90] sm:$0xff]  ;;  %v495_v33 = vld [vmem:[#allocation9 + $0x98] sm:$0xff]  ;;  %v496_v35 = vld [vmem:[#allocation9 + $0xa0] sm:$0xff] }
  0x4f   :  { %1830 = vmatpush3.bf16.msra.mxu1 %v1829_v41  ;;  %1807 = vmatprep.subr.bf16.mxu0 %v2063_v0  ;;  %v1865_v34 = vpack.c.bf16 %v495_v33, %v494_v32  ;;  %v497_v36 = vld [vmem:[#allocation9 + $0xa8] sm:$0xff]  ;;  %v470_v37 = vld [vmem:[#allocation9] sm:$0xff]  ;;  %v498_v41 = vld [vmem:[#allocation9 + $0xb0] sm:$0xff] }
  0x50   :  { %1831 = vmatprep.subr.bf16.mxu1 %v2063_v0  ;;  %v471_v38 = vld [vmem:[#allocation9 + $0x8] sm:$0xff]  ;;  %v1868_v39 = vpack.c.bf16 %v497_v36, %v496_v35  ;;  %v499_v42 = vld [vmem:[#allocation9 + $0xb8] sm:$0xff]  ;;  %v472_v43 = vld [vmem:[#allocation9 + $0x10] sm:$0xff] }
  0x51   :  { %v1886_v40 = vpack.c.bf16 %v471_v38, %v470_v37  ;;  %v473_v44 = vld [vmem:[#allocation9 + $0x18] sm:$0xff]  ;;  %v1871_v45 = vpack.c.bf16 %v499_v42, %v498_v41  ;;  %v501_v48 = vld [vmem:[#allocation9 + $0xc8] sm:$0xff]  ;;  %v474_v49 = vld [vmem:[#allocation9 + $0x20] sm:$0xff] }
  0x52   :  { %1809 = vmatpush3.bf16.msra.mxu0 %v1808_v46  ;;  %v1889_v46 = vpack.c.bf16 %v473_v44, %v472_v43  ;;  %v475_v50 = vld [vmem:[#allocation9 + $0x28] sm:$0xff]  ;;  %v503_v54 = vld [vmem:[#allocation9 + $0xd8] sm:$0xff]  ;;  %v476_v55 = vld [vmem:[#allocation9 + $0x30] sm:$0xff] }
  0x53   :  { %1833 = vmatpush3.bf16.msra.mxu1 %v1832_v47  ;;  %1810 = vmatprep.subr.bf16.mxu0 %v2063_v0  ;;  %v500_v47 = vld [vmem:[#allocation9 + $0xc0] sm:$0xff]  ;;  %v479_v62 = vld [vmem:[#allocation9 + $0x48] sm:$0xff]  ;;  %v507_v4 = vld [vmem:[#allocation9 + $0xf8] sm:$0xff] }
  0x54   :  { %1834 = vmatprep.subr.bf16.mxu1 %v2063_v0  ;;  %v1874_v51 = vpack.c.bf16 %v501_v48, %v500_v47  ;;  %v504_v59 = vld [vmem:[#allocation9 + $0xe0] sm:$0xff]  ;;  %v480_v5 = vld [vmem:[#allocation9 + $0x50] sm:$0xff]  ;;  %v483_v10 = vld [vmem:[#allocation9 + $0x68] sm:$0xff] }
  0x55   :  { %v478_v61 = vld [vmem:[#allocation9 + $0x40] sm:$0xff]  ;;  %v1369_v41 = vld [vmem:[%s2391_s2] ss:$0 sm:$0xff] }
  0x56   :  { %1812 = vmatpush3.bf16.msra.mxu0 %v1811_v52  ;;  %v1892_v52 = vpack.c.bf16 %v475_v50, %v474_v49  ;;  %v482_v9 = vld [vmem:[#allocation9 + $0x60] sm:$0xff] }
  0x57   :  { %1836 = vmatpush3.bf16.msra.mxu1 %v1835_v53  ;;  %1837 = vmatprep.subr.bf16.mxu0 %v2063_v0  ;;  %v502_v53 = vld [vmem:[#allocation9 + $0xd0] sm:$0xff] }
  0x58   :  { %1861 = vmatprep.subr.bf16.mxu1 %v2063_v0 }
  0x59   :  { %1540 = vmatmul.mubr.f32.vlgmr.msra.gmra.mrb[0].mxu0 %v2167_v24  ;;  %v298_v24 = vld [vmem:[#allocation2 + $0x2] sm:$0xff] }
  0x5a   :  { %1587 = vmatmul.mubr.f32.vlgmr.msra.gmra.mrb[0].mxu1 %v75_v57  ;;  %1839 = vmatpush3.bf16.msra.mxu0 %v1838_v56  ;;  %v477_v56 = vld [vmem:[#allocation9 + $0x38] sm:$0xff]  ;;  %v1877_v57 = vpack.c.bf16 %v503_v54, %v502_v53 }
  0x5b   :  { %1840 = vmatprep.subr.bf16.mxu0 %v2063_v0  ;;  %1542 = vmatprep.mubr.msk.f32.mxu0 %vm2065_vm0, %v2064_v1  ;;  %v1895_v58 = vpack.c.bf16 %v477_v56, %v476_v55 }
  0x5c   :  { %1589 = vmatprep.mubr.msk.f32.mxu1 %vm2065_vm0, %v2064_v1 }
  0x5d   :  { %1543 = vmatmul.mubr.f32.gmra.mrb[2].mxu0 %v64_v31  ;;  %v1862_v31 = vpack.c.bf16 %v493_v30, %v492_v29 }
  0x5e   :  { %1842 = vmatpush3.bf16.msra.mxu0 %v1841_v60  ;;  %1590 = vmatmul.mubr.f32.gmra.mrb[2].mxu1 %v76_v63  ;;  %v505_v60 = vld [vmem:[#allocation9 + $0xe8] sm:$0xff] }
  0x5f   :  { %1843 = vmatprep.subr.bf16.mxu0 %v2063_v0  ;;  %1545 = vmatprep.mubr.msk.f32.mxu0 %vm2065_vm0, %v2064_v1  ;;  %v1880_v63 = vpack.c.bf16 %v505_v60, %v504_v59 }
  0x60   :  { %1592 = vmatprep.mubr.msk.f32.mxu1 %vm2065_vm0, %v2064_v1  ;;  %1863 = vmatpush3.bf16.msra.mxu1 %v1862_v31 }
  0x61   :  { %1546 = vmatmul.mubr.f32.gmra.mrb[4].mxu0 %v98_v3  ;;  %1864 = vmatprep.subr.bf16.mxu1 %v2063_v0  ;;  %v506_v3 = vld [vmem:[#allocation9 + $0xf0] sm:$0xff] }
  0x62   :  { %1845 = vmatpush3.bf16.msra.mxu0 %v1844_v2  ;;  %1593 = vmatmul.mubr.f32.gmra.mrb[4].mxu1 %v77_v6  ;;  %v1898_v2 = vpack.c.bf16 %v479_v62, %v478_v61  ;;  %v481_v6 = vld [vmem:[#allocation9 + $0x58] sm:$0xff] }
  0x63   :  { %1846 = vmatprep.subr.bf16.mxu0 %v2063_v0  ;;  %1548 = vmatprep.mubr.msk.f32.mxu0 %vm2065_vm0, %v2064_v1 }
  0x64   :  { %1595 = vmatprep.mubr.msk.f32.mxu1 %vm2065_vm0, %v2064_v1  ;;  %1866 = vmatpush3.bf16.msra.mxu1 %v1865_v34 }
  0x65   :  { %1549 = vmatmul.mubr.f32.gmra.mrb[6].mxu0 %v99_v8  ;;  %1867 = vmatprep.subr.bf16.mxu1 %v2063_v0  ;;  %v1901_v8 = vpack.c.bf16 %v481_v6, %v480_v5  ;;  %v694_v5 = vld [vmem:[#allocation9 + $0x100] sm:$0xff]  ;;  %v695_v6 = vld [vmem:[#allocation9 + $0x108] sm:$0xff] }
  0x66   :  { %1848 = vmatpush3.bf16.msra.mxu0 %v1847_v7  ;;  %1596 = vmatmul.mubr.f32.gmra.mrb[6].mxu1 %v78_v11  ;;  %v1883_v7 = vpack.c.bf16 %v507_v4, %v506_v3  ;;  %v1904_v11 = vpack.c.bf16 %v483_v10, %v482_v9 }
  0x67   :  { %1849 = vmatprep.subr.bf16.mxu0 %v2063_v0  ;;  %1551 = vmatprep.mubr.msk.f32.mxu0 %vm2065_vm0, %v2064_v1 }
  0x68   :  { %1598 = vmatprep.mubr.msk.f32.mxu1 %vm2065_vm0, %v2064_v1  ;;  %1869 = vmatpush3.bf16.msra.mxu1 %v1868_v39 }
  0x69   :  { %1552 = vmatmul.mubr.f32.gmra.mrb[8].mxu0 %v100_v13  ;;  %1870 = vmatprep.subr.bf16.mxu1 %v2063_v0  ;;  %v485_v13 = vld [vmem:[#allocation9 + $0x78] sm:$0xff] }
  0x6a   :  { %1851 = vmatpush3.bf16.msra.mxu0 %v1850_v12  ;;  %1599 = vmatmul.mubr.f32.gmra.mrb[8].mxu1 %v79_v16  ;;  %v484_v12 = vld [vmem:[#allocation9 + $0x70] sm:$0xff] }
  0x6b   :  { %1852 = vmatprep.subr.bf16.mxu0 %v2063_v0  ;;  %1633 = vmatprep.mubr.msk.f32.mxu0 %vm2065_vm0, %v2064_v1  ;;  %v1907_v14 = vpack.c.bf16 %v485_v13, %v484_v12  ;;  %v696_v13 = vld [vmem:[#allocation9 + $0x110] sm:$0xff] }
  0x6c   :  { %1680 = vmatprep.mubr.msk.f32.mxu1 %vm2065_vm0, %v2064_v1  ;;  %1872 = vmatpush3.bf16.msra.mxu1 %v1871_v45 }
  0x6d   :  { %1873 = vmatprep.subr.bf16.mxu1 %v2063_v0 }
  0x6e   :  { %1854 = vmatpush3.bf16.msra.mxu0 %v1853_v17 }
  0x6f   :  { %1855 = vmatprep.subr.bf16.mxu0 %v2063_v0 }
  0x70   :  { %1875 = vmatpush3.bf16.msra.mxu1 %v1874_v51 }
  0x71   :  { %1876 = vmatprep.subr.bf16.mxu1 %v2063_v0 }
  0x72   :  { %1857 = vmatpush3.bf16.msra.mxu0 %v1856_v20 }
  0x73   :  { %1858 = vmatprep.subr.bf16.mxu0 %v2063_v0 }
  0x74   :  { %1878 = vmatpush3.bf16.msra.mxu1 %v1877_v57 }
  0x75   :  { %1879 = vmatprep.subr.bf16.mxu1 %v2063_v0 }
  0x76   :  { %1860 = vmatpush3.bf16.msra.mxu0 %v1859_v23 }
  0x77   :  { %1885 = vmatprep.subr.bf16.mxu0 %v2063_v0 }
  0x78   :  { %1881 = vmatpush3.bf16.msra.mxu1 %v1880_v63 }
  0x79   :  { %1634 = vmatmul.mubr.f32.vlgmr.msra.gmra.mrb[10].mxu0 %v298_v24  ;;  %1882 = vmatprep.subr.bf16.mxu1 %v2063_v0 }
  0x7a   :  { %1636 = vmatprep.mubr.msk.f32.mxu0 %vm2065_vm0, %v2064_v1  ;;  %1887 = vmatpush3.bf16.msra.mxu0 %v1886_v40 }
  0x7b   :  { %1888 = vmatprep.subr.bf16.mxu0 %v2063_v0 }
  0x7c   :  { %1884 = vmatpush3.bf16.msra.mxu1 %v1883_v7 }
  0x7d   :  { %1637 = vmatmul.mubr.f32.gmra.mrb[12].mxu0 %v299_v25  ;;  %1909 = vmatprep.subr.bf16.mxu1 %v2063_v0 }
  0x7e   :  { %1639 = vmatprep.mubr.msk.f32.mxu0 %vm2065_vm0, %v2064_v1  ;;  %1890 = vmatpush3.bf16.msra.mxu0 %v1889_v46 }
  0x7f   :  { %1891 = vmatprep.subr.bf16.mxu0 %v2063_v0 }
  0x81   :  { %1640 = vmatmul.mubr.f32.gmra.mrb[14].mxu0 %v300_v26 }
  0x82   :  { %1642 = vmatprep.mubr.msk.f32.mxu0 %vm2065_vm0, %v2064_v1  ;;  %1893 = vmatpush3.bf16.msra.mxu0 %v1892_v52 }
  0x83   :  { %1894 = vmatprep.subr.bf16.mxu0 %v2063_v0 }
  0x85   :  { %1643 = vmatmul.mubr.f32.gmra.mrb[16].mxu0 %v301_v27 }
  0x86   :  { %1645 = vmatprep.mubr.msk.f32.mxu0 %vm2065_vm0, %v2064_v1  ;;  %1896 = vmatpush3.bf16.msra.mxu0 %v1895_v58 }
  0x87   :  { %1897 = vmatprep.subr.bf16.mxu0 %v2063_v0 }
  0x89   :  { %1646 = vmatmul.mubr.f32.gmra.mrb[18].mxu0 %v302_v28 }
  0x8a   :  { %1727 = vmatprep.mubr.msk.f32.mxu0 %vm2065_vm0, %v2064_v1  ;;  %1899 = vmatpush3.bf16.msra.mxu0 %v1898_v2 }
  0x8b   :  { %1900 = vmatprep.subr.bf16.mxu0 %v2063_v0 }
  0x8e   :  { %1902 = vmatpush3.bf16.msra.mxu0 %v1901_v8 }
  0x8f   :  { %1903 = vmatprep.subr.bf16.mxu0 %v2063_v0 }
  0x92   :  { %1905 = vmatpush3.bf16.msra.mxu0 %v1904_v11  ;;  %v1910_v11 = vpack.c.bf16 %v695_v6, %v694_v5 }
  0x93   :  { %1906 = vmatprep.subr.bf16.mxu0 %v2063_v0 }
  0x96   :  { %1908 = vmatpush3.bf16.msra.mxu0 %v1907_v14  ;;  %v697_v14 = vld [vmem:[#allocation9 + $0x118] sm:$0xff] }
 0x12c   :  { %v184_v15 = vpop.f32.mrb[0].mxu0 }
 0x12d   :  { %v1541_v16 = vpop.f32.mrb[1].mxu0  ;;  %v274_v17 = vpop.f32.mrb[0].mxu1 }
 0x12e   :  { %v275_v18 = vadd.f32 %v274_v17, %v184_v15  ;;  %v1588_v19 = vpop.f32.mrb[1].mxu1 }
 0x12f   :  { %v1913_v19 = vpack.c.bf16 %v697_v14, %v696_v13 }
 0x130   :  { %v189_v20 = vpop.f32.mrb[2].mxu0 }
 0x131   :  { %v1544_v21 = vpop.f32.mrb[3].mxu0  ;;  %v279_v22 = vpop.f32.mrb[2].mxu1 }
 0x132   :  { %v280_v23 = vadd.f32 %v279_v22, %v189_v20  ;;  %v1591_v24 = vpop.f32.mrb[3].mxu1  ;;  %v698_v20 = vld [vmem:[#allocation9 + $0x120] sm:$0xff]  ;;  %v699_v21 = vld [vmem:[#allocation9 + $0x128] sm:$0xff] }
 0x134   :  { %v194_v25 = vpop.f32.mrb[4].mxu0 }
 0x135   :  { %v1547_v26 = vpop.f32.mrb[5].mxu0  ;;  %v284_v27 = vpop.f32.mrb[4].mxu1 }
 0x136   :  { %v285_v28 = vadd.f32 %v284_v27, %v194_v25  ;;  %v1594_v29 = vpop.f32.mrb[5].mxu1  ;;  %v1916_v25 = vpack.c.bf16 %v699_v21, %v698_v20  ;;  %v700_v26 = vld [vmem:[#allocation9 + $0x130] sm:$0xff]  ;;  %v701_v27 = vld [vmem:[#allocation9 + $0x138] sm:$0xff] }
 0x138   :  { %v199_v30 = vpop.f32.mrb[6].mxu0 }
 0x139   :  { %v1550_v31 = vpop.f32.mrb[7].mxu0  ;;  %v289_v32 = vpop.f32.mrb[6].mxu1 }
 0x13a   :  { %v290_v33 = vadd.f32 %v289_v32, %v199_v30  ;;  %v1597_v34 = vpop.f32.mrb[7].mxu1  ;;  %v1919_v32 = vpack.c.bf16 %v701_v27, %v700_v26 }
 0x13c   :  { %v204_v35 = vpop.f32.mrb[8].mxu0 }
 0x13d   :  { %v1553_v36 = vpop.f32.mrb[9].mxu0  ;;  %v294_v37 = vpop.f32.mrb[8].mxu1 }
 0x13e   :  { %v295_v38 = vadd.f32 %v294_v37, %v204_v35  ;;  %v1600_v39 = vpop.f32.mrb[9].mxu1  ;;  %v702_v36 = vld [vmem:[#allocation9 + $0x140] sm:$0xff]  ;;  %v703_v37 = vld [vmem:[#allocation9 + $0x148] sm:$0xff] }
 0x14c   :  { %v386_v40 = vpop.f32.mrb[10].mxu0 }
 0x14d   :  { %v410_v42 = vadd.f32 %v386_v40, %v275_v18  ;;  %v1635_v43 = vpop.f32.mrb[11].mxu0  ;;  %v1922_v40 = vpack.c.bf16 %v703_v37, %v702_v36  ;;  %v2066_v36 = vmov 1966171168  }
 0x14e   :  { %v851_v37 = vunpack.c.l.s4 %v2066_v36 }
 0x14f   :  { %v422_v44 = vadd.f32 %v1369_v41, %v410_v42 }
 0x150   :  { %v391_v45 = vpop.f32.mrb[12].mxu0 }
 0x151   :  { %v432_v46 = vmin.f32 %v422_v44, 0.0  ;;  %v411_v47 = vadd.f32 %v391_v45, %v280_v23  ;;  %v1638_v48 = vpop.f32.mrb[13].mxu0  ;;  %vm427_vm1 = vcmp.gt.f32.partialorder %v422_v44, 0.0 }
 0x152   :  { %v707_v48 = vld [vmem:[#allocation9 + $0x168] sm:$0xff] }
 0x153   :  { %v437_v49 = vmul.f32 1.442695, %v432_v46  ;;  %v423_v50 = vadd.f32 %v1369_v41, %v411_v47  ;;  %v706_v47 = vld [vmem:[#allocation9 + $0x160] sm:$0xff] }
 0x154   :  { %v396_v51 = vpop.f32.mrb[14].mxu0 }
 0x155   :  { %1944 = vpow2.f32 %v437_v49  ;;  %v433_v52 = vmin.f32 %v423_v50, 0.0  ;;  %v412_v53 = vadd.f32 %v396_v51, %v285_v28  ;;  %v1641_v54 = vpop.f32.mrb[15].mxu0  ;;  %vm428_vm2 = vcmp.gt.f32.partialorder %v423_v50, 0.0 }
 0x156   :  { %v1928_v51 = vpack.c.bf16 %v707_v48, %v706_v47 }
 0x157   :  { %v439_v55 = vmul.f32 1.442695, %v433_v52  ;;  %v424_v56 = vadd.f32 %v1369_v41, %v412_v53  ;;  %v708_v52 = vld [vmem:[#allocation9 + $0x170] sm:$0xff]  ;;  %v709_v53 = vld [vmem:[#allocation9 + $0x178] sm:$0xff] }
 0x158   :  { %v401_v57 = vpop.f32.mrb[16].mxu0  ;;  %v1931_v54 = vpack.c.bf16 %v709_v53, %v708_v52  ;;  %v2067_v53 = vmov 1983009808  }
 0x159   :  { %1946 = vpow2.f32 %v439_v55  ;;  %v434_v58 = vmin.f32 %v424_v56, 0.0  ;;  %v413_v59 = vadd.f32 %v401_v57, %v290_v33  ;;  %v1644_v60 = vpop.f32.mrb[17].mxu0  ;;  %vm429_vm3 = vcmp.gt.f32.partialorder %v424_v56, 0.0 }
 0x15b   :  { %v441_v61 = vmul.f32 1.442695, %v434_v58  ;;  %v425_v62 = vadd.f32 %v1369_v41, %v413_v59 }
 0x15c   :  { %v406_v63 = vpop.f32.mrb[18].mxu0 }
 0x15d   :  { %1948 = vpow2.f32 %v441_v61  ;;  %v435_v2 = vmin.f32 %v425_v62, 0.0  ;;  %v414_v3 = vadd.f32 %v406_v63, %v295_v38  ;;  %v1647_v4 = vpop.f32.mrb[19].mxu0  ;;  %vm430_vm4 = vcmp.gt.f32.partialorder %v425_v62, 0.0 }
 0x15f   :  { %v1945_v7 = vpop.eup %1944  ;;  %v443_v8 = vmul.f32 1.442695, %v435_v2  ;;  %v426_v9 = vadd.f32 %v1369_v41, %v414_v3  ;;  %v704_v41 = vld [vmem:[#allocation9 + $0x150] sm:$0xff] }
 0x160   :  { %v1370_v10 = vadd.f32 -1.0, %v1945_v7 }
 0x161   :  { %1950 = vpow2.f32 %v443_v8  ;;  %v436_v12 = vmin.f32 %v426_v9, 0.0  ;;  %vm431_vm5 = vcmp.gt.f32.partialorder %v426_v9, 0.0 }
 0x162   :  { %v452_v15 = vsel %vm427_vm1, %v422_v44, %v1370_v10  ;;  %v705_v44 = vld [vmem:[#allocation9 + $0x158] sm:$0xff] }
 0x163   :  { %v1947_v16 = vpop.eup %1946  ;;  %457 = vst [vmem:[#allocation3 + $0x1] sm:$0xff] %v452_v15  ;;  %v445_v17 = vmul.f32 1.442695, %v436_v12  ;;  %1681 = vmatmul.mubr.f32.vlgmr.msra.gmra.mrb[10].mxu1 %v452_v15  ;;  %v1925_v46 = vpack.c.bf16 %v705_v44, %v704_v41 }
 0x164   :  { %v1371_v18 = vadd.f32 -1.0, %v1947_v16  ;;  %1911 = vmatpush3.bf16.msra.mxu1 %v1910_v11  ;;  %1683 = vmatprep.mubr.msk.f32.mxu1 %vm2065_vm0, %v2064_v1 }
 0x165   :  { %1952 = vpow2.f32 %v445_v17  ;;  %1912 = vmatprep.subr.bf16.mxu1 %v2063_v0 }
 0x166   :  { %v453_v22 = vsel %vm428_vm2, %v423_v50, %v1371_v18 }
 0x167   :  { %v1949_v23 = vpop.eup %1948  ;;  %458 = vst [vmem:[#allocation3 + $0x9] sm:$0xff] %v453_v22  ;;  %1684 = vmatmul.mubr.f32.gmra.mrb[12].mxu1 %v453_v22  ;;  %v1375_v22 = vld [vmem:[%s2393_s4] ss:$0 sm:$0xff]  ;;  %s2068_s4 = smov [#allocation10]  }
 0x168   :  { %v1372_v24 = vadd.f32 -1.0, %v1949_v23  ;;  %1914 = vmatpush3.bf16.msra.mxu1 %v1913_v19  ;;  %1686 = vmatprep.mubr.msk.f32.mxu1 %vm2065_vm0, %v2064_v1  ;;  %s1356_s8 = sshll.u32 %s2068_s4, 4  ;;  %s1357_s8 = int_to_ptr.vmem [resolvable:$true] %s1356_s8 }
 0x169   :  { %1915 = vmatprep.subr.bf16.mxu1 %v2063_v0  ;;  %s2030_s9 = scalar_lea.vmem %s1357_s8, 1024  ;;  %p2035_p11 = scmp.lt.s32.totalorder %s1357_s8, %s1357_s8 }
 0x16a   :  { %v454_v28 = vsel %vm429_vm3, %v424_v56, %v1372_v24  ;;  %v465_v29 = vld [vmem:[#allocation3] sm:$0xff]  ;;  %p2031_p10 = scmp.ne.s32.totalorder %s1357_s8, %s2030_s9  ;;  %p2036_p12 = scmp.lt.s32.totalorder %s2030_s9, %s2030_s9 }
 0x16b   :  { %v1951_v30 = vpop.eup %1950  ;;  %459 = vst [vmem:[#allocation3 + $0x11] sm:$0xff] %v454_v28  ;;  %1728 = vmatmul.mubr.f32.vlgmr.msra.gmra.mrb[20].mxu0 %v465_v29 }
 0x16c   :  { %464 = vst [vmem:[#allocation3 + $0x11] sm:$0x3] %v2064_v1  ;;  %v1373_v31 = vadd.f32 -1.0, %v1951_v30  ;;  %1730 = vmatprep.mubr.msk.f32.mxu0 %vm2065_vm0, %v2064_v1  ;;  %1917 = vmatpush3.bf16.msra.mxu1 %v1916_v25  ;;  %p2037_p13 = por %p2036_p12, %p2035_p11 }
 0x16d   :  { %1918 = vmatprep.subr.bf16.mxu1 %v2063_v0 }
 0x16e   :  { %v455_v33 = vsel %vm430_vm4, %v425_v62, %v1373_v31  ;;  %v466_v34 = vld [vmem:[#allocation3 + $0x8] sm:$0xff]  ;;  %p2038_p0 = pnand %p2037_p13, %p2031_p10 }
 0x16f   :  { %v1953_v35 = vpop.eup %1952  ;;  %460 = vst [vmem:[#allocation3 + $0x19] sm:$0xff] %v455_v33  ;;  %1731 = vmatmul.mubr.f32.gmra.mrb[22].mxu0 %v466_v34  ;;  %v688_v55 = vld [vmem:[#allocation3 + $0x2] sm:$0xff] }
 0x170   :  { %v1374_v38 = vadd.f32 -1.0, %v1953_v35  ;;  %1733 = vmatprep.mubr.msk.f32.mxu0 %vm2065_vm0, %v2064_v1  ;;  %1920 = vmatpush3.bf16.msra.mxu1 %v1919_v32 }
 0x171   :  { %1921 = vmatprep.subr.bf16.mxu1 %v2063_v0 }
 0x172   :  { %v456_v39 = vsel %vm431_vm5, %v426_v9, %v1374_v38  ;;  %v853_v38 = vlaneseq }
 0x173   :  { %461 = vst [vmem:[#allocation3 + $0x21] sm:$0x3] %v456_v39  ;;  %v488_v42 = vld [vmem:[#allocation3 + $0x11] sm:$0xff] }
 0x174   :  { %v467_v43 = vld [vmem:[#allocation3 + $0x10] sm:$0xff]  ;;  %1687 = vmatmul.mubr.f32.gmra.mrb[14].mxu1 %v488_v42 }
 0x175   :  { %1734 = vmatmul.mubr.f32.gmra.mrb[24].mxu0 %v467_v43  ;;  %1689 = vmatprep.mubr.msk.f32.mxu1 %vm2065_vm0, %v2064_v1  ;;  %v689_v56 = vld [vmem:[#allocation3 + $0xa] sm:$0xff] }
 0x176   :  { %1736 = vmatprep.mubr.msk.f32.mxu0 %vm2065_vm0, %v2064_v1  ;;  %v468_v45 = vld [vmem:[#allocation3 + $0x18] sm:$0xff]  ;;  %1923 = vmatpush3.bf16.msra.mxu1 %v1922_v40 }
 0x177   :  { %1924 = vmatprep.subr.bf16.mxu1 %v2063_v0  ;;  %v690_v57 = vld [vmem:[#allocation3 + $0x12] sm:$0xff] }
 0x178   :  { %1690 = vmatmul.mubr.f32.gmra.mrb[16].mxu1 %v455_v33 }
 0x179   :  { %1737 = vmatmul.mubr.f32.gmra.mrb[26].mxu0 %v468_v45  ;;  %1692 = vmatprep.mubr.msk.f32.mxu1 %vm2065_vm0, %v2064_v1  ;;  %v852_v45 = vunpack.c.0.s8 %v851_v37 }
 0x17a   :  { %1739 = vmatprep.mubr.msk.f32.mxu0 %vm2065_vm0, %v2064_v1  ;;  %v490_v49 = vld [vmem:[#allocation3 + $0x21] sm:$0x3]  ;;  %1926 = vmatpush3.bf16.msra.mxu1 %v1925_v46  ;;  %v854_v46 = vshrl.u32 %v853_v38, 7 }
 0x17b   :  { %v469_v50 = vld [vmem:[#allocation3 + $0x20] sm:$0x3]  ;;  %1927 = vmatprep.subr.bf16.mxu1 %v2063_v0 }
 0x17c   :  { %1693 = vmatmul.mubr.f32.gmra.mrb[18].mxu1 %v490_v49  ;;  %v691_v58 = vld [vmem:[#allocation3 + $0x1a] sm:$0xff] }
 0x17d   :  { %1740 = vmatmul.mubr.f32.gmra.mrb[28].mxu0 %v469_v50  ;;  %1774 = vmatprep.mubr.msk.f32.mxu1 %vm2065_vm0, %v2064_v1 }
 0x17e   :  { %1929 = vmatpush3.bf16.msra.mxu1 %v1928_v51 }
 0x17f   :  { %1930 = vmatprep.subr.bf16.mxu1 %v2063_v0  ;;  %v692_v0 = vld [vmem:[#allocation3 + $0x22] sm:$0x3] }
 0x182   :  { %1932 = vmatpush3.bf16.msra.mxu1 %v1931_v54  ;;  %v1014_v54 = vunpack.c.l.s4 %v2067_v53 }
 0x185   :  { %1775 = vmatmul.mubr.f32.vlgmr.msra.gmra.mrb[20].mxu1 %v688_v55 }
 0x186   :  { %1777 = vmatprep.mubr.msk.f32.mxu1 %vm2065_vm0, %v2064_v1 }
 0x189   :  { %1778 = vmatmul.mubr.f32.gmra.mrb[22].mxu1 %v689_v56  ;;  %v2282_v56 = vsub.s32 %v852_v45, %v854_v46 }
 0x18a   :  { %1780 = vmatprep.mubr.msk.f32.mxu1 %vm2065_vm0, %v2064_v1 }
 0x18d   :  { %1781 = vmatmul.mubr.f32.gmra.mrb[24].mxu1 %v690_v57 }
 0x18e   :  { %1783 = vmatprep.mubr.msk.f32.mxu1 %vm2065_vm0, %v2064_v1 }
 0x191   :  { %1784 = vmatmul.mubr.f32.gmra.mrb[26].mxu1 %v691_v58 }
 0x192   :  { %1786 = vmatprep.mubr.msk.f32.mxu1 %vm2065_vm0, %v2064_v1 }
 0x195   :  { %1787 = vmatmul.mubr.f32.gmra.mrb[28].mxu1 %v692_v0 }
 0x236   :  { %v574_v59 = vpop.f32.mrb[10].mxu1 }
 0x237   :  { %v1682_v60 = vpop.f32.mrb[11].mxu1 }
 0x23a   :  { %v579_v61 = vpop.f32.mrb[12].mxu1 }
 0x23b   :  { %v1685_v62 = vpop.f32.mrb[13].mxu1 }
 0x23e   :  { %v664_v63 = vpop.f32.mrb[20].mxu0 }
 0x23f   :  { %v665_v2 = vadd.f32 %v664_v63, %v574_v59  ;;  %v1729_v3 = vpop.f32.mrb[21].mxu0 }
 0x242   :  { %v669_v4 = vpop.f32.mrb[22].mxu0 }
 0x243   :  { %v670_v5 = vadd.f32 %v669_v4, %v579_v61  ;;  %v1732_v6 = vpop.f32.mrb[23].mxu0  ;;  %v1015_v61 = vunpack.c.0.s8 %v1014_v54  ;;  %v2288_v4 = vsub.s32 0, %v854_v46 }
 0x247   :  { %v584_v7 = vpop.f32.mrb[14].mxu1 }
 0x248   :  { %v674_v8 = vpop.f32.mrb[24].mxu0  ;;  %v1688_v10 = vpop.f32.mrb[15].mxu1 }
 0x249   :  { %v675_v9 = vadd.f32 %v674_v8, %v584_v7  ;;  %v1735_v11 = vpop.f32.mrb[25].mxu0 }
 0x24b   :  { %v589_v12 = vpop.f32.mrb[16].mxu1 }
 0x24c   :  { %v679_v13 = vpop.f32.mrb[26].mxu0  ;;  %v1691_v14 = vpop.f32.mrb[17].mxu1 }
 0x24d   :  { %v680_v1 = vadd.f32 %v679_v13, %v589_v12  ;;  %v1738_v15 = vpop.f32.mrb[27].mxu0 }
 0x24f   :  { %v594_v16 = vpop.f32.mrb[18].mxu1 }
 0x250   :  { %v684_v17 = vpop.f32.mrb[28].mxu0  ;;  %v1694_v19 = vpop.f32.mrb[19].mxu1 }
 0x251   :  { %v685_v18 = vadd.f32 %v684_v17, %v594_v16  ;;  %v1741_v20 = vpop.f32.mrb[29].mxu0 }
 0x258   :  { %v776_v21 = vpop.f32.mrb[20].mxu1 }
 0x259   :  { %v800_v23 = vadd.f32 %v776_v21, %v665_v2  ;;  %v1776_v24 = vpop.f32.mrb[21].mxu1 }
 0x25b   :  { %v812_v25 = vadd.f32 %v1375_v22, %v800_v23 }
 0x25c   :  { %v781_v26 = vpop.f32.mrb[22].mxu1 }
 0x25d   :  { %v822_v27 = vmin.f32 %v812_v25, 0.0  ;;  %v801_v28 = vadd.f32 %v781_v26, %v670_v5  ;;  %v1779_v29 = vpop.f32.mrb[23].mxu1  ;;  %vm817_vm6 = vcmp.gt.f32.partialorder %v812_v25, 0.0 }
 0x25f   :  { %v827_v30 = vmul.f32 1.442695, %v822_v27  ;;  %v813_v31 = vadd.f32 %v1375_v22, %v801_v28 }
 0x260   :  { %v786_v32 = vpop.f32.mrb[24].mxu1 }
 0x261   :  { %1954 = vpow2.f32 %v827_v30  ;;  %v823_v33 = vmin.f32 %v813_v31, 0.0  ;;  %v802_v34 = vadd.f32 %v786_v32, %v675_v9  ;;  %v1782_v35 = vpop.f32.mrb[25].mxu1  ;;  %vm818_vm7 = vcmp.gt.f32.partialorder %v813_v31, 0.0 }
 0x262   :  { %v2292_v9 = vsub.s32 %v1015_v61, %v854_v46 }
 0x263   :  { %v829_v39 = vmul.f32 1.442695, %v823_v33  ;;  %v2276_v40 = vadd.f32 %v1375_v22, %v802_v34 }
 0x264   :  { %v791_v41 = vpop.f32.mrb[26].mxu1 }
 0x265   :  { %1956 = vpow2.f32 %v829_v39  ;;  %v824_v42 = vmin.f32 %v2276_v40, 0.0  ;;  %v803_v43 = vadd.f32 %v791_v41, %v680_v1  ;;  %v1785_v44 = vpop.f32.mrb[27].mxu1  ;;  %vm819_vm8 = vcmp.gt.f32.partialorder %v2276_v40, 0.0 }
 0x267   :  { %v831_v47 = vmul.f32 1.442695, %v824_v42  ;;  %v2279_v48 = vadd.f32 %v1375_v22, %v803_v43 }
 0x268   :  { %v796_v49 = vpop.f32.mrb[28].mxu1 }
 0x269   :  { %1958 = vpow2.f32 %v831_v47  ;;  %v825_v50 = vmin.f32 %v2279_v48, 0.0  ;;  %v804_v51 = vadd.f32 %v796_v49, %v685_v18  ;;  %v1788_v52 = vpop.f32.mrb[29].mxu1  ;;  %vm820_vm9 = vcmp.gt.f32.partialorder %v2279_v48, 0.0 }
 0x26b   :  { %v1955_v55 = vpop.eup %1954  ;;  %v2284_v57 = vadd.f32 %v1375_v22, %v804_v51  ;;  %v833_v0 = vmul.f32 1.442695, %v825_v50 }
 0x26c   :  { %v1376_v58 = vadd.f32 -1.0, %v1955_v55 }
 0x26d   :  { %v826_v59 = vmin.f32 %v2284_v57, 0.0  ;;  %1960 = vpow2.f32 %v833_v0  ;;  %vm821_vm10 = vcmp.gt.f32.partialorder %v2284_v57, 0.0 }
 0x26e   :  { %v842_v60 = vsel %vm817_vm6, %v812_v25, %v1376_v58 }
 0x26f   :  { %v1957_v62 = vpop.eup %1956  ;;  %v849_v63 = vcombine.high %v842_v60, %v842_v60  ;;  %v856_v2 = vrot.slane %v842_v60, %v2282_v56  ;;  %v835_v3 = vmul.f32 1.442695, %v826_v59 }
 0x270   :  { %v1377_v5 = vadd.f32 -1.0, %v1957_v62 }
 0x271   :  { %v863_v6 = vrot.slane %v849_v63, %v2282_v56  ;;  %v864_v7 = vcombine.high %v856_v2, %v856_v2  ;;  %v872_v8 = vrot.slane %v856_v2, %v2282_v56  ;;  %1962 = vpow2.f32 %v835_v3 }
 0x272   :  { %v843_v10 = vsel %vm818_vm7, %v813_v31, %v1377_v5 }
 0x273   :  { %v1959_v11 = vpop.eup %1958  ;;  %v865_v12 = vcombine.high %v863_v6, %v863_v6  ;;  %v879_v13 = vrot.slane %v863_v6, %v2282_v56  ;;  %v886_v1 = vrot.slane %v864_v7, %v2282_v56  ;;  %v894_v14 = vcombine.high %v872_v8, %v872_v8 }
 0x274   :  { %v950_v15 = vrot.slane %v872_v8, %v2288_v4  ;;  %v898_v16 = vcombine.high %v843_v10, %v843_v10  ;;  %v905_v17 = vrot.slane %v843_v10, %v2282_v56  ;;  %v1378_v18 = vadd.f32 -1.0, %v1959_v11 }
 0x275   :  { %v893_v19 = vrot.slane %v865_v12, %v2282_v56  ;;  %v895_v20 = vcombine.high %v879_v13, %v879_v13  ;;  %v896_v21 = vcombine.high %v886_v1, %v886_v1  ;;  %v954_v22 = vrot.slane %v886_v1, %v2288_v4 }
 0x276   :  { %v958_v23 = vrot.slane %v894_v14, %v2288_v4  ;;  %v966_v24 = vrot.slane %v879_v13, %v2288_v4  ;;  %v912_v25 = vrot.slane %v898_v16, %v2282_v56  ;;  %v913_v26 = vcombine.high %v905_v17, %v905_v17 }
 0x277   :  { %v897_v27 = vcombine.high %v893_v19, %v893_v19  ;;  %v962_v28 = vrot.slane %v896_v21, %v2288_v4  ;;  %v970_v29 = vrot.slane %v893_v19, %v2288_v4  ;;  %v974_v30 = vrot.slane %v895_v20, %v2288_v4  ;;  %v1961_v44 = vpop.eup %1960 }
 0x278   :  { %v1011_v31 = vcombine.low %v950_v15, %v954_v22  ;;  %v914_v32 = vcombine.high %v912_v25, %v912_v25  ;;  %v921_v33 = vrot.slane %v905_v17, %v2282_v56  ;;  %v928_v34 = vrot.slane %v912_v25, %v2282_v56 }
 0x279   :  { %v978_v35 = vrot.slane %v897_v27, %v2288_v4  ;;  %v1012_v36 = vcombine.low %v958_v23, %v962_v28  ;;  %v1028_v37 = vcombine.low %v966_v24, %v970_v29  ;;  %v935_v38 = vrot.slane %v913_v26, %v2282_v56 }
 0x27a   :  { %v1019_v39 = vrot.slane %v1011_v31, %v2292_v9  ;;  %v942_v41 = vrot.slane %v914_v32, %v2282_v56  ;;  %v943_v42 = vcombine.high %v921_v33, %v921_v33  ;;  %v944_v43 = vcombine.high %v928_v34, %v928_v34 }
 0x27b   :  { %v1026_v45 = vrot.slane %v1012_v36, %v2292_v9  ;;  %v1029_v46 = vcombine.low %v974_v30, %v978_v35  ;;  %v1036_v47 = vrot.slane %v1028_v37, %v2292_v9  ;;  %v945_v49 = vcombine.high %v935_v38, %v935_v38  ;;  %v1963_v50 = vpop.eup %1962 }
 0x27c   :  { %v946_v51 = vcombine.high %v942_v41, %v942_v41  ;;  %v982_v52 = vrot.slane %v921_v33, %v2288_v4  ;;  %v986_v53 = vrot.slane %v935_v38, %v2288_v4  ;;  %v990_v54 = vrot.slane %v943_v42, %v2288_v4 }
 0x27d   :  { %v1027_v55 = vcombine.low %v1019_v39, %v1026_v45  ;;  %v1043_v58 = vrot.slane %v1029_v46, %v2292_v9  ;;  %v994_v0 = vrot.slane %v945_v49, %v2288_v4  ;;  %v998_v59 = vrot.slane %v928_v34, %v2288_v4 }
 0x27e   :  { %v1002_v60 = vrot.slane %v942_v41, %v2288_v4  ;;  %v1006_v61 = vrot.slane %v944_v43, %v2288_v4  ;;  %v1010_v62 = vrot.slane %v946_v51, %v2288_v4  ;;  %v1045_v63 = vcombine.low %v982_v52, %v986_v53 }
 0x27f   :  { %v1044_v2 = vcombine.low %v1036_v47, %v1043_v58  ;;  %1083 = vst [vmem:[#allocation10] sm:$0xff] %v1027_v55  ;;  %v1046_v3 = vcombine.low %v990_v54, %v994_v0  ;;  %v844_v5 = vsel %vm819_vm8, %v2276_v40, %v1378_v18  ;;  %v1379_v6 = vadd.f32 -1.0, %v1961_v44 }
 0x280   :  { %v1062_v7 = vcombine.low %v998_v59, %v1002_v60  ;;  %v1063_v8 = vcombine.low %v1006_v61, %v1010_v62  ;;  %v1090_v10 = vcombine.high %v844_v5, %v844_v5  ;;  %v1053_v11 = vrot.slane %v1045_v63, %v2292_v9 }
 0x281   :  { %1084 = vst [vmem:[#allocation10 + $0x8] sm:$0xff] %v1044_v2  ;;  %v1060_v12 = vrot.slane %v1046_v3, %v2292_v9  ;;  %v1097_v13 = vrot.slane %v844_v5, %v2282_v56  ;;  %v845_v1 = vsel %vm820_vm9, %v2279_v48, %v1379_v6  ;;  %v1380_v31 = vadd.f32 -1.0, %v1963_v50 }
 0x282   :  { %v1070_v14 = vrot.slane %v1062_v7, %v2292_v9  ;;  %v1077_v15 = vrot.slane %v1063_v8, %v2292_v9  ;;  %v1104_v40 = vrot.slane %v1090_v10, %v2282_v56  ;;  %v1139_v16 = vcombine.high %v845_v1, %v845_v1 }
 0x283   :  { %v1061_v17 = vcombine.low %v1053_v11, %v1060_v12  ;;  %v1105_v18 = vcombine.high %v1097_v13, %v1097_v13  ;;  %v1113_v19 = vrot.slane %v1097_v13, %v2282_v56  ;;  %v1146_v20 = vrot.slane %v845_v1, %v2282_v56 }
 0x284   :  { %v1078_v21 = vcombine.low %v1070_v14, %v1077_v15  ;;  %v1106_v22 = vcombine.high %v1104_v40, %v1104_v40  ;;  %v1120_v23 = vrot.slane %v1104_v40, %v2282_v56  ;;  %v1153_v24 = vrot.slane %v1139_v16, %v2282_v56 }
 0x285   :  { %1085 = vst [vmem:[#allocation10 + $0x10] sm:$0xff] %v1061_v17  ;;  %v1127_v48 = vrot.slane %v1105_v18, %v2282_v56  ;;  %v1135_v25 = vcombine.high %v1113_v19, %v1113_v19  ;;  %v1154_v26 = vcombine.high %v1146_v20, %v1146_v20  ;;  %v1162_v27 = vrot.slane %v1146_v20, %v2282_v56 }
 0x286   :  { %1086 = vst [vmem:[#allocation10 + $0x18] sm:$0xff] %v1078_v21  ;;  %v1134_v28 = vrot.slane %v1106_v22, %v2282_v56  ;;  %v1136_v29 = vcombine.high %v1120_v23, %v1120_v23  ;;  %v1155_v30 = vcombine.high %v1153_v24, %v1153_v24  ;;  %v1221_v34 = vrot.slane %v1120_v23, %v2288_v4 }
 0x287   :  { %v1137_v32 = vcombine.high %v1127_v48, %v1127_v48  ;;  %v1213_v33 = vrot.slane %v1135_v25, %v2288_v4  ;;  %v1176_v35 = vrot.slane %v1154_v26, %v2282_v56  ;;  %v1169_v38 = vrot.slane %v1153_v24, %v2282_v56 }
 0x288   :  { %v1138_v36 = vcombine.high %v1134_v28, %v1134_v28  ;;  %v1225_v37 = vrot.slane %v1134_v28, %v2288_v4  ;;  %v1183_v39 = vrot.slane %v1155_v30, %v2282_v56  ;;  %v1229_v42 = vrot.slane %v1136_v29, %v2288_v4 }
 0x289   :  { %v1217_v41 = vrot.slane %v1137_v32, %v2288_v4  ;;  %v1184_v43 = vcombine.high %v1162_v27, %v1162_v27  ;;  %v1186_v44 = vcombine.high %v1176_v35, %v1176_v35  ;;  %v1237_v49 = vrot.slane %v1162_v27, %v2288_v4 }
 0x28a   :  { %v1233_v45 = vrot.slane %v1138_v36, %v2288_v4  ;;  %v1275_v46 = vcombine.low %v1221_v34, %v1225_v37  ;;  %v1187_v47 = vcombine.high %v1183_v39, %v1183_v39  ;;  %v1241_v51 = vrot.slane %v1176_v35, %v2288_v4 }
 0x28b   :  { %v1274_v50 = vcombine.low %v1213_v33, %v1217_v41  ;;  %v1245_v52 = vrot.slane %v1184_v43, %v2288_v4  ;;  %v1249_v53 = vrot.slane %v1186_v44, %v2288_v4  ;;  %v1253_v58 = vrot.slane %v1169_v38, %v2288_v4 }
 0x28c   :  { %v1289_v54 = vrot.slane %v1275_v46, %v2292_v9  ;;  %v1291_v55 = vcombine.low %v1229_v42, %v1233_v45  ;;  %v1257_v0 = vrot.slane %v1183_v39, %v2288_v4  ;;  %v1185_v60 = vcombine.high %v1169_v38, %v1169_v38 }
 0x28d   :  { %v1282_v59 = vrot.slane %v1274_v50, %v2292_v9  ;;  %v1292_v61 = vcombine.low %v1237_v49, %v1241_v51  ;;  %v1308_v63 = vcombine.low %v1245_v52, %v1249_v53  ;;  %v846_v3 = vsel %vm821_vm10, %v2284_v57, %v1380_v31 }
 0x28e   :  { %v1299_v62 = vrot.slane %v1291_v55, %v2292_v9  ;;  %v1309_v2 = vcombine.low %v1253_v58, %v1257_v0  ;;  %v1265_v6 = vrot.slane %v1187_v47, %v2288_v4  ;;  %v1194_v8 = vrot.slane %v846_v3, %v2282_v56 }
 0x28f   :  { %v1290_v5 = vcombine.low %v1282_v59, %v1289_v54  ;;  %v1306_v7 = vrot.slane %v1292_v61, %v2292_v9  ;;  %v1316_v10 = vrot.slane %v1308_v63, %v2292_v9  ;;  %v1261_v12 = vrot.slane %v1185_v60, %v2288_v4 }
 0x290   :  { %v1323_v11 = vrot.slane %v1309_v2, %v2292_v9  ;;  %v1195_v1 = vcombine.high %v1194_v8, %v1194_v8  ;;  %v1202_v14 = vrot.slane %v1194_v8, %v2282_v56 }
 0x291   :  { %1347 = vst [vmem:[#allocation10 + $0x20] sm:$0xff] %v1290_v5  ;;  %v1307_v13 = vcombine.low %v1299_v62, %v1306_v7  ;;  %v1325_v57 = vcombine.low %v1261_v12, %v1265_v6 }
 0x292   :  { %v1324_v15 = vcombine.low %v1316_v10, %v1323_v11  ;;  %v1209_v40 = vrot.slane %v1195_v1, %v2282_v56  ;;  %v1269_v16 = vrot.slane %v1202_v14, %v2288_v4 }
 0x293   :  { %1348 = vst [vmem:[#allocation10 + $0x28] sm:$0xff] %v1307_v13  ;;  %v1333_v19 = vrot.slane %v1325_v57, %v2292_v9 }
 0x294   :  { %1349 = vst [vmem:[#allocation10 + $0x30] sm:$0xff] %v1324_v15  ;;  %v1273_v17 = vrot.slane %v1209_v40, %v2288_v4 }
 0x296   :  { %v1326_v18 = vcombine.low %v1269_v16, %v1273_v17 }
 0x298   :  { %v1340_v20 = vrot.slane %v1326_v18, %v2292_v9 }
 0x29a   :  { %v1341_v21 = vcombine.low %v1333_v19, %v1340_v20 }
 0x29c   :  { %1350 = vst [vmem:[#allocation10 + $0x38] sm:$0xff] %v1341_v21 }
 0x29d   :  { %2041 = shalt.err (!%p2038_p0)
}
 0x29e   :  { %s2042_s12 = scalar_lea.hbm %s2394_s5, 1024 }
 0x29f   :  { %p2043_p1 = scmp.ne.s32.totalorder %s2394_s5, %s2042_s12  ;;  %p2046_p2 = scmp.lt.u32.totalorder %s2042_s12, %s2394_s5 }
 0x2a1   :  { %p2048_p3 = pnand %p2046_p2, %p2043_p1 }
 0x2a3   :  { %2051 = shalt.err (!%p2048_p3)
}
 0x2a4   :  { %1362 = dma.vmem_to_hbm [thread:$0]  %s1357_s8, 1024, %s2394_s5, [#allocation6], %s2060_s30, %s2060_s30, %s2061_s6  }
 0x2a5   :  { %2056 = dma.done.wait [#allocation6], 1024  }
 0x2a6   :  { %2057 = vsyncadd [#allocation6], 4294966272 }
 0x2a7   :  { %1366 = vsyncpa [#allocation5], 1 }
 0x2a8   :  { %1367 = vsyncpa [#allocation8], 1 }
 0x2a9   :  { %1368 = vsyncpa [#allocation6], 1 }

</bundles_post_ra>
